<compile_context>
chip_gen: v5e
topology: v5e:2x2
jax: 0.10.0
libtpu: 0.0.40
codegen_flags: <defaults>
</compile_context>

<pallas_src>
import functools

import jax
import jax.numpy as jnp
from jax.experimental import pallas as pl
from jax.experimental.pallas import tpu as pltpu

_LANE = 128          # hidden width is zero-padded to a multiple of this
_MAX_TILE_B = 1024   # max batch-tile rows (multiple of 8)
_MAC_MAX_K = 8       # layer-1 contraction dims <= this use VPU MACs, not the MXU


def _round_up(x, m):
    return -(-x // m) * m


def _pick_tile_b(batch):
    """Big tiles (amortize ~0.35us/grid-step) but >= 2 grid steps when possible
    so dimension_semantics=("parallel",) can shard across both v7x TensorCores."""
    if batch <= 8:
        return batch                      # block == full dim satisfies the (8,128) rule
    half = _round_up(-(-batch // 2), 8)   # cdiv(batch, 2) rounded to a sublane multiple
    return min(_MAX_TILE_B, half)


def _resident_spec(shape, single_buffer):
    """Full-array, constant-index BlockSpec for weights/biases (VMEM-resident)."""
    idx = lambda b: (0,) * len(shape)
    if single_buffer:
        try:
            # Block index never changes across the grid -> no need to double-buffer.
            return pl.BlockSpec(shape, idx, pipeline_mode=pl.Buffered(1))
        except (TypeError, ValueError):
            pass
    return pl.BlockSpec(shape, idx)


def _critic_kernel(n_layers, s_ref, a_ref, *refs):
    """Fused MLP forward for one batch tile.

    refs = (W1s, W1a, b1, [W_i, b_i, ...], W_last, b_last, out_ref)
    Weight layout is (in, out); hidden-layer weights are bf16, layer-1 (VPU path)
    and the last layer are f32.  No cross-row reductions.
    """
    out_ref = refs[-1]
    p = refs[:-1]
    w1s_ref, w1a_ref, b1_ref = p[0], p[1], p[2]

    def first_layer_term(x_ref, w_ref):
        # Tiny contraction dim -> VPU broadcast MACs beat a near-empty MXU matmul
        # (and skip the MXU operand relayout / result-FIFO pops).
        k_dim = x_ref.shape[1]
        if k_dim <= _MAC_MAX_K:
            x = x_ref[...]
            w = w_ref[...]
            acc = x[:, 0:1] * w[0:1, :]
            for k in range(1, k_dim):
                acc = acc + x[:, k:k + 1] * w[k:k + 1, :]
            return acc
        return jnp.dot(x_ref[...], w_ref[...], preferred_element_type=jnp.float32)

    # Layer 1: fused concat via split state/action contributions.
    h = first_layer_term(s_ref, w1s_ref) + first_layer_term(a_ref, w1a_ref) + b1_ref[...]
    if n_layers > 1:
        h = jnp.maximum(h, 0.0)

    for i in range(1, n_layers):
        w_ref = p[3 + 2 * (i - 1)]     # (in, out)
        b_ref = p[4 + 2 * (i - 1)]     # (1, out), f32
        lhs = h.astype(w_ref.dtype)    # bf16 for hidden layers, no-op for f32 last layer
        h = jnp.dot(lhs, w_ref[...], preferred_element_type=jnp.float32) + b_ref[...]
        if i < n_layers - 1:
            h = jnp.maximum(h, 0.0)

    out_ref[...] = h.astype(out_ref.dtype)


def prepare_kernel_params(params, state_dim):
    """One-time preprocessing of PyTorch-layout params [(W (out,in), b (out,))].

    * transpose to (in, out) and split W1 into state / action halves (fused concat)
    * zero-pad the hidden width to a multiple of 128 lanes (inert through
      matmul + ReLU) -> lane-dense loads/stores and full MXU tiles
    * hidden-layer weights cast to bf16 (MXU-native); layer-1 (VPU path), the
      last layer and all biases stay f32.
    """
    n_layers = len(params)
    out_dim = int(params[-1][0].shape[0])
    hidden = int(params[0][0].shape[0])
    h_pad = _round_up(hidden, _LANE) if n_layers > 1 else hidden
    col_pad = h_pad - hidden if n_layers > 1 else 0

    w1, b1 = params[0]
    w1 = jnp.asarray(w1, jnp.float32)
    b1 = jnp.asarray(b1, jnp.float32).reshape(1, -1)
    w1s = w1[:, :state_dim].T                     # (state_dim, hidden)
    w1a = w1[:, state_dim:].T                     # (action_dim, hidden)
    if col_pad:
        w1s = jnp.pad(w1s, ((0, 0), (0, col_pad)))
        w1a = jnp.pad(w1a, ((0, 0), (0, col_pad)))
        b1 = jnp.pad(b1, ((0, 0), (0, col_pad)))
    flat = [w1s, w1a, b1]

    for i in range(1, n_layers):
        w, b = params[i]
        w = jnp.asarray(w, jnp.float32).T                    # (in, out)
        b = jnp.asarray(b, jnp.float32).reshape(1, -1)       # (1, out)
        last = (i == n_layers - 1)
        in_pad = h_pad - w.shape[0]
        out_pad = 0 if last else (h_pad - w.shape[1])
        if in_pad or out_pad:
            w = jnp.pad(w, ((0, in_pad), (0, out_pad)))
            b = jnp.pad(b, ((0, 0), (0, out_pad)))
        if not last:
            w = w.astype(jnp.bfloat16)                       # MXU-native operand dtype
        flat.append(w)
        flat.append(b)

    return flat, n_layers, out_dim


def build_critic_forward(n_layers, out_dim, single_buffer_weights=True):
    """Returns a jitted forward(state, action, *flat_params) -> (batch, out_dim) f32."""
    kernel = functools.partial(_critic_kernel, n_layers)

    @jax.jit
    def forward(state, action, *flat_params):
        state = state.astype(jnp.float32)
        action = action.astype(jnp.float32)
        batch = state.shape[0]
        tile_b = _pick_tile_b(batch)
        grid = (-(-batch // tile_b),)
        h_pad = flat_params[2].shape[1]

        in_specs = [
            pl.BlockSpec((tile_b, state.shape[1]), lambda b: (b, 0)),
            pl.BlockSpec((tile_b, action.shape[1]), lambda b: (b, 0)),
        ] + [_resident_spec(p.shape, single_buffer_weights) for p in flat_params]

        # VMEM budget: (<=double)-buffered weights + double-buffered activation
        # tiles + intermediates, with headroom.  v5e's default scoped limit is
        # only 16 MiB so set it explicitly; cap at v7x's 64 MiB physical VMEM.
        param_bytes = sum(p.size * p.dtype.itemsize for p in flat_params)
        act_bytes = 3 * tile_b * max(_LANE, state.shape[1] + action.shape[1]) * 4
        vmem_limit = int(2 * param_bytes + 4 * act_bytes + 8 * tile_b * h_pad * 4)
        vmem_limit = min(64 << 20, max(32 << 20, vmem_limit))

        weights = [flat_params[0], flat_params[1]] + list(flat_params[3::2])
        flops = 2 * batch * sum(int(w.shape[0] * w.shape[1]) for w in weights)
        bytes_accessed = int(state.size * 4 + action.size * 4
                             + batch * out_dim * 4 + param_bytes)

        return pl.pallas_call(
            kernel,
            out_shape=jax.ShapeDtypeStruct((batch, out_dim), jnp.float32),
            grid=grid,
            in_specs=in_specs,
            out_specs=pl.BlockSpec((tile_b, out_dim), lambda b: (b, 0)),
            compiler_params=pltpu.CompilerParams(
                dimension_semantics=("parallel",),
                vmem_limit_bytes=vmem_limit),
            cost_estimate=pl.CostEstimate(
                flops=flops, transcendentals=0, bytes_accessed=bytes_accessed),
        )(state, action, *flat_params)

    return forward


# ---------------------------------------------------------------------------
# Deterministic init mimicking nn.Linear defaults + pure-JAX references.
# ---------------------------------------------------------------------------
def init_linear_params(key, in_f, out_f):
    k_w, k_b = jax.random.split(key)
    bound = 1.0 / (in_f ** 0.5)
    w = jax.random.uniform(k_w, (out_f, in_f), jnp.float32, -bound, bound)
    b = jax.random.uniform(k_b, (out_f,), jnp.float32, -bound, bound)
    return w, b


def make_critic_params(key, state_dim, action_dim, hidden_size, hidden_layers):
    dims = [state_dim + action_dim] + [hidden_size] * hidden_layers + [1]
    params = []
    for i in range(len(dims) - 1):
        key, sub = jax.random.split(key)
        params.append(init_linear_params(sub, dims[i], dims[i + 1]))
    return params


def _reference_forward(state, action, params, bf16_hidden=False):
    """Pure-JAX reference.  bf16_hidden=True mimics the kernel's bf16 hidden-layer
    matmul operands (with f32 accumulation) for a tight numerical comparison."""
    h = jnp.concatenate([state, action], axis=-1).astype(jnp.float32)
    n = len(params)
    for i, (w, b) in enumerate(params):
        wt = w.T.astype(jnp.float32)
        if bf16_hidden and 0 < i < n - 1:
            h = jnp.dot(h.astype(jnp.bfloat16), wt.astype(jnp.bfloat16),
                        preferred_element_type=jnp.float32)
        else:
            h = jnp.dot(h, wt, preferred_element_type=jnp.float32)
        h = h + b.astype(jnp.float32)
        if i < n - 1:
            h = jnp.maximum(h, 0.0)
    return h


if __name__ == "__main__":
    key = jax.random.PRNGKey(0)
    batch, state_dim, action_dim = 8, 3, 1
    hidden_size, hidden_layers = 32, 2

    k_params, k_s, k_a = jax.random.split(key, 3)
    params = make_critic_params(k_params, state_dim, action_dim,
                                hidden_size, hidden_layers)
    state = jax.random.normal(k_s, (batch, state_dim), jnp.float32)
    action = jax.random.normal(k_a, (batch, action_dim), jnp.float32)

    # One-time parameter preprocessing (not on the per-call path).
    flat_params, n_layers, out_dim = prepare_kernel_params(params, state_dim)

    try:
        critic_forward = build_critic_forward(n_layers, out_dim,
                                              single_buffer_weights=True)
        out = jax.block_until_ready(critic_forward(state, action, *flat_params))
    except Exception:
        # Fallback if this JAX build rejects single-buffered weight BlockSpecs.
        critic_forward = build_critic_forward(n_layers, out_dim,
                                              single_buffer_weights=False)
        out = jax.block_until_ready(critic_forward(state, action, *flat_params))

    assert out.shape == (batch, out_dim)
    # Tight check vs a reference using the same bf16 hidden-matmul operands.
    ref_bf16 = _reference_forward(state, action, params, bf16_hidden=True)
    assert jnp.allclose(out, ref_bf16, atol=1e-3, rtol=1e-3), "mismatch vs bf16 ref"
    # Loose check vs the full-f32 PyTorch-equivalent reference (bf16 rounding only).
    ref_f32 = _reference_forward(state, action, params, bf16_hidden=False)
    assert jnp.allclose(out, ref_f32, atol=5e-2, rtol=5e-2), "mismatch vs f32 ref"
    print("KERNEL_OK")
</pallas_src>

<mosaic_0001>
module attributes {stable_mosaic.version = 11 : i64} {
  func.func @_critic_kernel(%arg0: i32, %arg1: memref<8x3xf32, #tpu.memory_space<vmem>>, %arg2: memref<8x1xf32, #tpu.memory_space<vmem>>, %arg3: memref<3x128xf32, #tpu.memory_space<vmem>>, %arg4: memref<1x128xf32, #tpu.memory_space<vmem>>, %arg5: memref<1x128xf32, #tpu.memory_space<vmem>>, %arg6: memref<128x128xbf16, #tpu.memory_space<vmem>>, %arg7: memref<1x128xf32, #tpu.memory_space<vmem>>, %arg8: memref<128x1xf32, #tpu.memory_space<vmem>>, %arg9: memref<1x1xf32, #tpu.memory_space<vmem>>, %arg10: memref<8x1xf32, #tpu.memory_space<vmem>>) attributes {dimension_semantics = [#tpu.dimension_semantics<parallel>], iteration_bounds = array<i64: 1>, scalar_prefetch = 0 : i64, scratch_operands = 0 : i64, tpu.core_type = #tpu.core_type<tc>, window_params = [{transform_indices = @transform_0, window_bounds = array<i64: 8, 3>}, {transform_indices = @transform_1, window_bounds = array<i64: 8, 1>}, {pipeline_mode = #tpu.pipeline_mode<synchronous>, transform_indices = @transform_2, window_bounds = array<i64: 3, 128>}, {pipeline_mode = #tpu.pipeline_mode<synchronous>, transform_indices = @transform_3, window_bounds = array<i64: 1, 128>}, {pipeline_mode = #tpu.pipeline_mode<synchronous>, transform_indices = @transform_4, window_bounds = array<i64: 1, 128>}, {pipeline_mode = #tpu.pipeline_mode<synchronous>, transform_indices = @transform_5, window_bounds = array<i64: 128, 128>}, {pipeline_mode = #tpu.pipeline_mode<synchronous>, transform_indices = @transform_6, window_bounds = array<i64: 1, 128>}, {pipeline_mode = #tpu.pipeline_mode<synchronous>, transform_indices = @transform_7, window_bounds = array<i64: 128, 1>}, {pipeline_mode = #tpu.pipeline_mode<synchronous>, transform_indices = @transform_8, window_bounds = array<i64: 1, 1>}, {transform_indices = @transform_9, window_bounds = array<i64: 8, 1>}]} {
    %c0 = arith.constant 0 : index
    %c0_0 = arith.constant 0 : index
    %0 = vector.load %arg1[%c0, %c0_0] : memref<8x3xf32, #tpu.memory_space<vmem>>, vector<8x3xf32>
    %c0_1 = arith.constant 0 : index
    %c0_2 = arith.constant 0 : index
    %1 = vector.load %arg3[%c0_1, %c0_2] : memref<3x128xf32, #tpu.memory_space<vmem>>, vector<3x128xf32>
    %2 = vector.extract_strided_slice %0 {offsets = [0, 0], sizes = [8, 1], strides = [1, 1]} : vector<8x3xf32> to vector<8x1xf32>
    %3 = vector.extract_strided_slice %1 {offsets = [0, 0], sizes = [1, 128], strides = [1, 1]} : vector<3x128xf32> to vector<1x128xf32>
    %4 = vector.broadcast %2 : vector<8x1xf32> to vector<8x128xf32>
    %5 = vector.broadcast %3 : vector<1x128xf32> to vector<8x128xf32>
    %6 = arith.mulf %4, %5 : vector<8x128xf32>
    %7 = vector.extract_strided_slice %0 {offsets = [0, 1], sizes = [8, 1], strides = [1, 1]} : vector<8x3xf32> to vector<8x1xf32>
    %8 = vector.extract_strided_slice %1 {offsets = [1, 0], sizes = [1, 128], strides = [1, 1]} : vector<3x128xf32> to vector<1x128xf32>
    %9 = vector.broadcast %7 : vector<8x1xf32> to vector<8x128xf32>
    %10 = vector.broadcast %8 : vector<1x128xf32> to vector<8x128xf32>
    %11 = arith.mulf %9, %10 : vector<8x128xf32>
    %12 = arith.addf %6, %11 : vector<8x128xf32>
    %13 = vector.extract_strided_slice %0 {offsets = [0, 2], sizes = [8, 1], strides = [1, 1]} : vector<8x3xf32> to vector<8x1xf32>
    %14 = vector.extract_strided_slice %1 {offsets = [2, 0], sizes = [1, 128], strides = [1, 1]} : vector<3x128xf32> to vector<1x128xf32>
    %15 = vector.broadcast %13 : vector<8x1xf32> to vector<8x128xf32>
    %16 = vector.broadcast %14 : vector<1x128xf32> to vector<8x128xf32>
    %17 = arith.mulf %15, %16 : vector<8x128xf32>
    %18 = arith.addf %12, %17 : vector<8x128xf32>
    %c0_3 = arith.constant 0 : index
    %c0_4 = arith.constant 0 : index
    %19 = vector.load %arg2[%c0_3, %c0_4] : memref<8x1xf32, #tpu.memory_space<vmem>>, vector<8x1xf32>
    %c0_5 = arith.constant 0 : index
    %c0_6 = arith.constant 0 : index
    %20 = vector.load %arg4[%c0_5, %c0_6] : memref<1x128xf32, #tpu.memory_space<vmem>>, vector<1x128xf32>
    %21 = vector.broadcast %19 : vector<8x1xf32> to vector<8x128xf32>
    %22 = vector.broadcast %20 : vector<1x128xf32> to vector<8x128xf32>
    %23 = arith.mulf %21, %22 : vector<8x128xf32>
    %24 = arith.addf %18, %23 : vector<8x128xf32>
    %c0_7 = arith.constant 0 : index
    %c0_8 = arith.constant 0 : index
    %25 = vector.load %arg5[%c0_7, %c0_8] : memref<1x128xf32, #tpu.memory_space<vmem>>, vector<1x128xf32>
    %26 = vector.broadcast %25 : vector<1x128xf32> to vector<8x128xf32>
    %27 = arith.addf %24, %26 : vector<8x128xf32>
    %cst = arith.constant 0.000000e+00 : f32
    %28 = vector.broadcast %cst : f32 to vector<8x128xf32>
    %29 = arith.maximumf %27, %28 : vector<8x128xf32>
    %30 = arith.truncf %29 : vector<8x128xf32> to vector<8x128xbf16>
    %c0_9 = arith.constant 0 : index
    %c0_10 = arith.constant 0 : index
    %31 = vector.load %arg6[%c0_9, %c0_10] : memref<128x128xbf16, #tpu.memory_space<vmem>>, vector<128x128xbf16>
    %cst_11 = arith.constant dense<0.000000e+00> : vector<8x128xf32>
    %32 = tpu.matmul %30, %31, %cst_11 {dimension_numbers = #tpu.dot_dimension_numbers<[1], [0], [0], [1], [0, 0, 1, 1], [], []>} : vector<8x128xbf16>, vector<128x128xbf16>, vector<8x128xf32> -> vector<8x128xf32>
    %c0_12 = arith.constant 0 : index
    %c0_13 = arith.constant 0 : index
    %33 = vector.load %arg7[%c0_12, %c0_13] : memref<1x128xf32, #tpu.memory_space<vmem>>, vector<1x128xf32>
    %34 = vector.broadcast %33 : vector<1x128xf32> to vector<8x128xf32>
    %35 = arith.addf %32, %34 : vector<8x128xf32>
    %cst_14 = arith.constant 0.000000e+00 : f32
    %36 = vector.broadcast %cst_14 : f32 to vector<8x128xf32>
    %37 = arith.maximumf %35, %36 : vector<8x128xf32>
    %c0_15 = arith.constant 0 : index
    %c0_16 = arith.constant 0 : index
    %38 = vector.load %arg8[%c0_15, %c0_16] : memref<128x1xf32, #tpu.memory_space<vmem>>, vector<128x1xf32>
    %cst_17 = arith.constant dense<0.000000e+00> : vector<8x1xf32>
    %39 = tpu.matmul %37, %38, %cst_17 {dimension_numbers = #tpu.dot_dimension_numbers<[1], [0], [0], [1], [0, 0, 1, 1], [], []>} : vector<8x128xf32>, vector<128x1xf32>, vector<8x1xf32> -> vector<8x1xf32>
    %c0_18 = arith.constant 0 : index
    %c0_19 = arith.constant 0 : index
    %40 = vector.load %arg9[%c0_18, %c0_19] : memref<1x1xf32, #tpu.memory_space<vmem>>, vector<1x1xf32>
    %41 = vector.broadcast %40 : vector<1x1xf32> to vector<8x1xf32>
    %42 = arith.addf %39, %41 : vector<8x1xf32>
    %c0_20 = arith.constant 0 : index
    %c0_21 = arith.constant 0 : index
    %43 = vector.load %arg10[%c0_20, %c0_21] : memref<8x1xf32, #tpu.memory_space<vmem>>, vector<8x1xf32>
    tpu.vector_store %arg10[%c0_20, %c0_21], %42 {strides = array<i32>} : memref<8x1xf32, #tpu.memory_space<vmem>>, vector<8x1xf32>,
    return
  }
  func.func @transform_0(%arg0: i32) -> (i32, i32) {
    %c0_i32 = arith.constant 0 : i32
    %c0_i32_0 = arith.constant 0 : i32
    return %arg0, %c0_i32 : i32, i32
  }
  func.func @transform_1(%arg0: i32) -> (i32, i32) {
    %c0_i32 = arith.constant 0 : i32
    %c0_i32_0 = arith.constant 0 : i32
    return %arg0, %c0_i32 : i32, i32
  }
  func.func @transform_2(%arg0: i32) -> (i32, i32) {
    %c0_i32 = arith.constant 0 : i32
    %c0_i32_0 = arith.constant 0 : i32
    %c0_i32_1 = arith.constant 0 : i32
    return %c0_i32, %c0_i32_0 : i32, i32
  }
  func.func @transform_3(%arg0: i32) -> (i32, i32) {
    %c0_i32 = arith.constant 0 : i32
    %c0_i32_0 = arith.constant 0 : i32
    %c0_i32_1 = arith.constant 0 : i32
    return %c0_i32, %c0_i32_0 : i32, i32
  }
  func.func @transform_4(%arg0: i32) -> (i32, i32) {
    %c0_i32 = arith.constant 0 : i32
    %c0_i32_0 = arith.constant 0 : i32
    %c0_i32_1 = arith.constant 0 : i32
    return %c0_i32, %c0_i32_0 : i32, i32
  }
  func.func @transform_5(%arg0: i32) -> (i32, i32) {
    %c0_i32 = arith.constant 0 : i32
    %c0_i32_0 = arith.constant 0 : i32
    %c0_i32_1 = arith.constant 0 : i32
    return %c0_i32, %c0_i32_0 : i32, i32
  }
  func.func @transform_6(%arg0: i32) -> (i32, i32) {
    %c0_i32 = arith.constant 0 : i32
    %c0_i32_0 = arith.constant 0 : i32
    %c0_i32_1 = arith.constant 0 : i32
    return %c0_i32, %c0_i32_0 : i32, i32
  }
  func.func @transform_7(%arg0: i32) -> (i32, i32) {
    %c0_i32 = arith.constant 0 : i32
    %c0_i32_0 = arith.constant 0 : i32
    %c0_i32_1 = arith.constant 0 : i32
    return %c0_i32, %c0_i32_0 : i32, i32
  }
  func.func @transform_8(%arg0: i32) -> (i32, i32) {
    %c0_i32 = arith.constant 0 : i32
    %c0_i32_0 = arith.constant 0 : i32
    %c0_i32_1 = arith.constant 0 : i32
    return %c0_i32, %c0_i32_0 : i32, i32
  }
  func.func @transform_9(%arg0: i32) -> (i32, i32) {
    %c0_i32 = arith.constant 0 : i32
    %c0_i32_0 = arith.constant 0 : i32
    return %arg0, %c0_i32 : i32, i32
  }
}

module attributes {stable_mosaic.version = 11 : i64} {
  func.func @_critic_kernel(%arg0: i32, %arg1: memref<8x3xf32, #tpu.memory_space<vmem>>, %arg2: memref<8x1xf32, #tpu.memory_space<vmem>>, %arg3: memref<3x128xf32, #tpu.memory_space<vmem>>, %arg4: memref<1x128xf32, #tpu.memory_space<vmem>>, %arg5: memref<1x128xf32, #tpu.memory_space<vmem>>, %arg6: memref<128x128xbf16, #tpu.memory_space<vmem>>, %arg7: memref<1x128xf32, #tpu.memory_space<vmem>>, %arg8: memref<128x1xf32, #tpu.memory_space<vmem>>, %arg9: memref<1x1xf32, #tpu.memory_space<vmem>>, %arg10: memref<8x1xf32, #tpu.memory_space<vmem>>) attributes {dimension_semantics = [#tpu.dimension_semantics<parallel>], iteration_bounds = array<i64: 1>, scalar_prefetch = 0 : i64, scratch_operands = 0 : i64, tpu.core_type = #tpu.core_type<tc>, window_params = [{transform_indices = @transform_0, window_bounds = array<i64: 8, 3>}, {transform_indices = @transform_1, window_bounds = array<i64: 8, 1>}, {pipeline_mode = #tpu.pipeline_mode<synchronous>, transform_indices = @transform_2, window_bounds = array<i64: 3, 128>}, {pipeline_mode = #tpu.pipeline_mode<synchronous>, transform_indices = @transform_3, window_bounds = array<i64: 1, 128>}, {pipeline_mode = #tpu.pipeline_mode<synchronous>, transform_indices = @transform_4, window_bounds = array<i64: 1, 128>}, {pipeline_mode = #tpu.pipeline_mode<synchronous>, transform_indices = @transform_5, window_bounds = array<i64: 128, 128>}, {pipeline_mode = #tpu.pipeline_mode<synchronous>, transform_indices = @transform_6, window_bounds = array<i64: 1, 128>}, {pipeline_mode = #tpu.pipeline_mode<synchronous>, transform_indices = @transform_7, window_bounds = array<i64: 128, 1>}, {pipeline_mode = #tpu.pipeline_mode<synchronous>, transform_indices = @transform_8, window_bounds = array<i64: 1, 1>}, {transform_indices = @transform_9, window_bounds = array<i64: 8, 1>}]} {
    %c0 = arith.constant 0 : index
    %c0_0 = arith.constant 0 : index
    %0 = vector.load %arg1[%c0, %c0_0] : memref<8x3xf32, #tpu.memory_space<vmem>>, vector<8x3xf32>
    %c0_1 = arith.constant 0 : index
    %c0_2 = arith.constant 0 : index
    %1 = vector.load %arg3[%c0_1, %c0_2] : memref<3x128xf32, #tpu.memory_space<vmem>>, vector<3x128xf32>
    %2 = vector.extract_strided_slice %0 {offsets = [0, 0], sizes = [8, 1], strides = [1, 1]} : vector<8x3xf32> to vector<8x1xf32>
    %3 = vector.extract_strided_slice %1 {offsets = [0, 0], sizes = [1, 128], strides = [1, 1]} : vector<3x128xf32> to vector<1x128xf32>
    %4 = vector.broadcast %2 : vector<8x1xf32> to vector<8x128xf32>
    %5 = vector.broadcast %3 : vector<1x128xf32> to vector<8x128xf32>
    %6 = arith.mulf %4, %5 : vector<8x128xf32>
    %7 = vector.extract_strided_slice %0 {offsets = [0, 1], sizes = [8, 1], strides = [1, 1]} : vector<8x3xf32> to vector<8x1xf32>
    %8 = vector.extract_strided_slice %1 {offsets = [1, 0], sizes = [1, 128], strides = [1, 1]} : vector<3x128xf32> to vector<1x128xf32>
    %9 = vector.broadcast %7 : vector<8x1xf32> to vector<8x128xf32>
    %10 = vector.broadcast %8 : vector<1x128xf32> to vector<8x128xf32>
    %11 = arith.mulf %9, %10 : vector<8x128xf32>
    %12 = arith.addf %6, %11 : vector<8x128xf32>
    %13 = vector.extract_strided_slice %0 {offsets = [0, 2], sizes = [8, 1], strides = [1, 1]} : vector<8x3xf32> to vector<8x1xf32>
    %14 = vector.extract_strided_slice %1 {offsets = [2, 0], sizes = [1, 128], strides = [1, 1]} : vector<3x128xf32> to vector<1x128xf32>
    %15 = vector.broadcast %13 : vector<8x1xf32> to vector<8x128xf32>
    %16 = vector.broadcast %14 : vector<1x128xf32> to vector<8x128xf32>
    %17 = arith.mulf %15, %16 : vector<8x128xf32>
    %18 = arith.addf %12, %17 : vector<8x128xf32>
    %c0_3 = arith.constant 0 : index
    %c0_4 = arith.constant 0 : index
    %19 = vector.load %arg2[%c0_3, %c0_4] : memref<8x1xf32, #tpu.memory_space<vmem>>, vector<8x1xf32>
    %c0_5 = arith.constant 0 : index
    %c0_6 = arith.constant 0 : index
    %20 = vector.load %arg4[%c0_5, %c0_6] : memref<1x128xf32, #tpu.memory_space<vmem>>, vector<1x128xf32>
    %21 = vector.broadcast %19 : vector<8x1xf32> to vector<8x128xf32>
    %22 = vector.broadcast %20 : vector<1x128xf32> to vector<8x128xf32>
    %23 = arith.mulf %21, %22 : vector<8x128xf32>
    %24 = arith.addf %18, %23 : vector<8x128xf32>
    %c0_7 = arith.constant 0 : index
    %c0_8 = arith.constant 0 : index
    %25 = vector.load %arg5[%c0_7, %c0_8] : memref<1x128xf32, #tpu.memory_space<vmem>>, vector<1x128xf32>
    %26 = vector.broadcast %25 : vector<1x128xf32> to vector<8x128xf32>
    %27 = arith.addf %24, %26 : vector<8x128xf32>
    %cst = arith.constant 0.000000e+00 : f32
    %28 = vector.broadcast %cst : f32 to vector<8x128xf32>
    %29 = arith.maximumf %27, %28 : vector<8x128xf32>
    %30 = arith.truncf %29 : vector<8x128xf32> to vector<8x128xbf16>
    %c0_9 = arith.constant 0 : index
    %c0_10 = arith.constant 0 : index
    %31 = vector.load %arg6[%c0_9, %c0_10] : memref<128x128xbf16, #tpu.memory_space<vmem>>, vector<128x128xbf16>
    %cst_11 = arith.constant dense<0.000000e+00> : vector<8x128xf32>
    %32 = tpu.matmul %30, %31, %cst_11 {dimension_numbers = #tpu.dot_dimension_numbers<[1], [0], [0], [1], [0, 0, 1, 1], [], []>} : vector<8x128xbf16>, vector<128x128xbf16>, vector<8x128xf32> -> vector<8x128xf32>
    %c0_12 = arith.constant 0 : index
    %c0_13 = arith.constant 0 : index
    %33 = vector.load %arg7[%c0_12, %c0_13] : memref<1x128xf32, #tpu.memory_space<vmem>>, vector<1x128xf32>
    %34 = vector.broadcast %33 : vector<1x128xf32> to vector<8x128xf32>
    %35 = arith.addf %32, %34 : vector<8x128xf32>
    %cst_14 = arith.constant 0.000000e+00 : f32
    %36 = vector.broadcast %cst_14 : f32 to vector<8x128xf32>
    %37 = arith.maximumf %35, %36 : vector<8x128xf32>
    %c0_15 = arith.constant 0 : index
    %c0_16 = arith.constant 0 : index
    %38 = vector.load %arg8[%c0_15, %c0_16] : memref<128x1xf32, #tpu.memory_space<vmem>>, vector<128x1xf32>
    %cst_17 = arith.constant dense<0.000000e+00> : vector<8x1xf32>
    %39 = tpu.matmul %37, %38, %cst_17 {dimension_numbers = #tpu.dot_dimension_numbers<[1], [0], [0], [1], [0, 0, 1, 1], [], []>} : vector<8x128xf32>, vector<128x1xf32>, vector<8x1xf32> -> vector<8x1xf32>
    %c0_18 = arith.constant 0 : index
    %c0_19 = arith.constant 0 : index
    %40 = vector.load %arg9[%c0_18, %c0_19] : memref<1x1xf32, #tpu.memory_space<vmem>>, vector<1x1xf32>
    %41 = vector.broadcast %40 : vector<1x1xf32> to vector<8x1xf32>
    %42 = arith.addf %39, %41 : vector<8x1xf32>
    %c0_20 = arith.constant 0 : index
    %c0_21 = arith.constant 0 : index
    %43 = vector.load %arg10[%c0_20, %c0_21] : memref<8x1xf32, #tpu.memory_space<vmem>>, vector<8x1xf32>
    tpu.vector_store %arg10[%c0_20, %c0_21], %42 {strides = array<i32>} : memref<8x1xf32, #tpu.memory_space<vmem>>, vector<8x1xf32>,
    return
  }
  func.func @transform_0(%arg0: i32) -> (i32, i32) {
    %c0_i32 = arith.constant 0 : i32
    %c0_i32_0 = arith.constant 0 : i32
    return %arg0, %c0_i32 : i32, i32
  }
  func.func @transform_1(%arg0: i32) -> (i32, i32) {
    %c0_i32 = arith.constant 0 : i32
    %c0_i32_0 = arith.constant 0 : i32
    return %arg0, %c0_i32 : i32, i32
  }
  func.func @transform_2(%arg0: i32) -> (i32, i32) {
    %c0_i32 = arith.constant 0 : i32
    %c0_i32_0 = arith.constant 0 : i32
    %c0_i32_1 = arith.constant 0 : i32
    return %c0_i32, %c0_i32_0 : i32, i32
  }
  func.func @transform_3(%arg0: i32) -> (i32, i32) {
    %c0_i32 = arith.constant 0 : i32
    %c0_i32_0 = arith.constant 0 : i32
    %c0_i32_1 = arith.constant 0 : i32
    return %c0_i32, %c0_i32_0 : i32, i32
  }
  func.func @transform_4(%arg0: i32) -> (i32, i32) {
    %c0_i32 = arith.constant 0 : i32
    %c0_i32_0 = arith.constant 0 : i32
    %c0_i32_1 = arith.constant 0 : i32
    return %c0_i32, %c0_i32_0 : i32, i32
  }
  func.func @transform_5(%arg0: i32) -> (i32, i32) {
    %c0_i32 = arith.constant 0 : i32
    %c0_i32_0 = arith.constant 0 : i32
    %c0_i32_1 = arith.constant 0 : i32
    return %c0_i32, %c0_i32_0 : i32, i32
  }
  func.func @transform_6(%arg0: i32) -> (i32, i32) {
    %c0_i32 = arith.constant 0 : i32
    %c0_i32_0 = arith.constant 0 : i32
    %c0_i32_1 = arith.constant 0 : i32
    return %c0_i32, %c0_i32_0 : i32, i32
  }
  func.func @transform_7(%arg0: i32) -> (i32, i32) {
    %c0_i32 = arith.constant 0 : i32
    %c0_i32_0 = arith.constant 0 : i32
    %c0_i32_1 = arith.constant 0 : i32
    return %c0_i32, %c0_i32_0 : i32, i32
  }
  func.func @transform_8(%arg0: i32) -> (i32, i32) {
    %c0_i32 = arith.constant 0 : i32
    %c0_i32_0 = arith.constant 0 : i32
    %c0_i32_1 = arith.constant 0 : i32
    return %c0_i32, %c0_i32_0 : i32, i32
  }
  func.func @transform_9(%arg0: i32) -> (i32, i32) {
    %c0_i32 = arith.constant 0 : i32
    %c0_i32_0 = arith.constant 0 : i32
    return %arg0, %c0_i32 : i32, i32
  }
}

</mosaic_0001>

<bundles_post_ra>
// kernel: forward.1
= control target key start
LH: loop header
LB: loop body
LE: loop exit
PB: predicated region body
PF: predicated region fallthrough
CT: control target
= control target key end

     0   :  { %v256_v0 = vmov 0   ;;  %v257_v2 = vmov 2   ;;  %v258_v6 = vmov 1   ;;  %vm198_vm0 = vcmask 7168   ;;  %s405_s0 = inlined_call_operand.vmem [shape: f32[8,3], index: 0, kind: input, shape index: {}]   ;;  %s406_s5 = inlined_call_operand.vmem [shape: bf16[128,128], index: 5, kind: input, shape index: {}]   ;;  %s407_s3 = inlined_call_operand.vmem [shape: f32[1,128], index: 3, kind: input, shape index: {}]   ;;  %s408_s4 = inlined_call_operand.vmem [shape: f32[1,128], index: 4, kind: input, shape index: {}]   ;;  %s409_s1 = inlined_call_operand.vmem [shape: f32[8,1], index: 1, kind: input, shape index: {}]   ;;  %s410_s6 = inlined_call_operand.vmem [shape: f32[1,128], index: 6, kind: input, shape index: {}]   ;;  %s411_s7 = inlined_call_operand.vmem [shape: f32[128,1], index: 7, kind: input, shape index: {}]   ;;  %s412_s2 = inlined_call_operand.vmem [shape: f32[3,128], index: 2, kind: input, shape index: {}]   ;;  %s413_s8 = inlined_call_operand.<no memory space> [shape: f32[1,1], index: 8, kind: input, shape index: {}]   ;;  %s414_s9 = inlined_call_operand.vmem [shape: f32[8,1], index: 9, kind: output, shape index: {}]  }
   0x1   :  { %247 = vset.pattern.permute.xlu0 %v256_v0  ;;  %v34_v1 = vld [vmem:[%s405_s0] sm:$0xff]  ;;  %249 = vset.pattern.permute.xlu1 %v257_v2  ;;  %v243_v3 = vld [vmem:[%s406_s5 + $0x38] sm:$0xff]  ;;  %v242_v4 = vld [vmem:[%s406_s5 + $0x30] sm:$0xff]  ;;  %v14_v49 = vstv %s413_s8 }
   0x2   :  { %38 = vperm.xlu0 %247, %v34_v1   ;;  %51 = vperm.xlu1 %249, %v34_v1   ;;  %v57_v5 = vld [vmem:[%s409_s1] sm:$0xff]  ;;  %v241_v7 = vld [vmem:[%s406_s5 + $0x28] sm:$0xff]  ;;  %v239_v9 = vld [vmem:[%s406_s5 + $0x18] sm:$0xff]  ;;  %15 = vst [vmem:[#allocation2] sm:$0x1] %v14_v49 }
   0x3   :  { %144 = vmatpush.bf16.msra.mxu0 %v243_v3  ;;  %v240_v8 = vld [vmem:[%s406_s5 + $0x20] sm:$0xff]  ;;  %v238_v10 = vld [vmem:[%s406_s5 + $0x10] sm:$0xff]  ;;  %v237_v11 = vld [vmem:[%s406_s5 + $0x8] sm:$0xff] }
   0x4   :  { %v236_v12 = vld [vmem:[%s406_s5] sm:$0xff]  ;;  %v173_v13 = vld [vmem:[%s411_s7 + $0x78] sm:$0xff]  ;;  %v172_v14 = vld [vmem:[%s411_s7 + $0x70] sm:$0xff] }
   0x5   :  { %178 = vmatpush.msra.mxu1 %v173_v13  ;;  %v171_v15 = vld [vmem:[%s411_s7 + $0x68] sm:$0xff]  ;;  %v170_v16 = vld [vmem:[%s411_s7 + $0x60] sm:$0xff]  ;;  %v169_v17 = vld [vmem:[%s411_s7 + $0x58] sm:$0xff] }
   0x6   :  { %v168_v20 = vld [vmem:[%s411_s7 + $0x50] sm:$0xff]  ;;  %v167_v21 = vld [vmem:[%s411_s7 + $0x48] sm:$0xff]  ;;  %v35_v22 = vld [vmem:[%s412_s2] sm:$0x7] }
   0x7   :  { %145 = vmatpush.bf16.msra.mxu0 %v242_v4  ;;  %179 = vmatpush.msra.mxu1 %v172_v14  ;;  %v166_v23 = vld [vmem:[%s411_s7 + $0x40] sm:$0xff]  ;;  %v41_v24 = vperm.slane %v35_v22, 0  ;;  %v47_v25 = vperm.slane %v35_v22, 1  ;;  %v165_v26 = vld [vmem:[%s411_s7 + $0x38] sm:$0xff]  ;;  %v54_v27 = vperm.slane %v35_v22, 2  ;;  %v164_v29 = vld [vmem:[%s411_s7 + $0x30] sm:$0xff] }
   0x8   :  { %v252_v28 = vld [vmem:[%s407_s3] ss:$0 sm:$0xff]  ;;  %v163_v34 = vld [vmem:[%s411_s7 + $0x28] sm:$0xff]  ;;  %v161_v41 = vld [vmem:[%s411_s7 + $0x18] sm:$0xff] }
   0x9   :  { %180 = vmatpush.msra.mxu1 %v171_v15  ;;  %v162_v38 = vld [vmem:[%s411_s7 + $0x20] sm:$0xff]  ;;  %v160_v46 = vld [vmem:[%s411_s7 + $0x10] sm:$0xff]  ;;  %v159_v47 = vld [vmem:[%s411_s7 + $0x8] sm:$0xff] }
   0xa   :  { %248 = vset.pattern.permute.xlu0 %v258_v6  ;;  %250 = vset.pattern.permute.xlu1 %v256_v0  ;;  %v253_v40 = vld [vmem:[%s408_s4] ss:$0 sm:$0xff] }
   0xb   :  { %44 = vperm.xlu0 %248, %v34_v1   ;;  %61 = vperm.xlu1 %250, %v57_v5   ;;  %v158_v48 = vld [vmem:[%s411_s7] sm:$0xff] }
   0xc   :  { %146 = vmatpush.bf16.msra.mxu0 %v241_v7  ;;  %181 = vmatpush.msra.mxu1 %v170_v16  ;;  %v254_v50 = vld [vmem:[%s410_s6] ss:$0 sm:$0xff] }
   0xd   :  { %v255_v55 = vld [vmem:[#allocation2] ss:$0 sm:$0xff] }
   0xe   :  { %182 = vmatpush.msra.mxu1 %v169_v17 }
  0x10   :  { %147 = vmatpush.bf16.msra.mxu0 %v240_v8  ;;  %183 = vmatpush.msra.mxu1 %v168_v20 }
  0x12   :  { %184 = vmatpush.msra.mxu1 %v167_v21 }
  0x13   :  { %251 = vset.pattern.permute.xlu0 %v256_v0 }
  0x14   :  { %148 = vmatpush.bf16.msra.mxu0 %v239_v9  ;;  %185 = vmatpush.msra.mxu1 %v166_v23 }
  0x16   :  { %186 = vmatpush.msra.mxu1 %v165_v26 }
  0x18   :  { %149 = vmatpush.bf16.msra.mxu0 %v238_v10  ;;  %187 = vmatpush.msra.mxu1 %v164_v29 }
  0x1a   :  { %188 = vmatpush.msra.mxu1 %v163_v34 }
  0x1c   :  { %150 = vmatpush.bf16.msra.mxu0 %v237_v11  ;;  %189 = vmatpush.msra.mxu1 %v162_v38 }
  0x1e   :  { %190 = vmatpush.msra.mxu1 %v161_v41 }
  0x20   :  { %151 = vmatpush.bf16.msra.mxu0 %v236_v12  ;;  %191 = vmatpush.msra.mxu1 %v160_v46 }
  0x22   :  { %192 = vmatpush.msra.mxu1 %v159_v47 }
  0x24   :  { %193 = vmatpush.msra.mxu1 %v158_v48 }
  0x74   :  { %v39_v18 = vpop.permute.xlu0 %38  ;;  %v52_v19 = vpop.permute.xlu1 %51 }
  0x75   :  { %v42_v32 = vmul.f32 %v41_v24, %v39_v18  ;;  %v55_v35 = vmul.f32 %v54_v27, %v52_v19 }
  0x7d   :  { %v45_v30 = vpop.permute.xlu0 %44  ;;  %v62_v31 = vpop.permute.xlu1 %61 }
  0x7e   :  { %v48_v33 = vmul.f32 %v47_v25, %v45_v30  ;;  %v67_v37 = vmul.f32 %v252_v28, %v62_v31 }
  0x80   :  { %v49_v36 = vadd.f32 %v48_v33, %v42_v32 }
  0x82   :  { %v56_v39 = vadd.f32 %v55_v35, %v49_v36 }
  0x84   :  { %v68_v42 = vadd.f32 %v67_v37, %v56_v39 }
  0x86   :  { %v73_v43 = vadd.f32 %v253_v40, %v68_v42 }
  0x88   :  { %v74_v44 = vmax.f32 %v73_v43, 0.0 }
  0x8a   :  { %v75_v45 = vpack.c.bf16 %v74_v44, %v74_v44 }
  0x8c   :  { %152 = vmatmul.bf16.vlgmr.msra.gmra.mxu0 %v75_v45 }
 0x109   :  { %v153_v51 = vpop.f32.mrf.mxu0 }
 0x10a   :  { %v154_v52 = vadd.f32 %v254_v50, %v153_v51 }
 0x10c   :  { %v157_v53 = vmax.f32 %v154_v52, 0.0 }
 0x10e   :  { %194 = vmatmul.f32.vlgmr.msra.gmra.mxu1 %v157_v53 }
 0x111   :  { %v155_v54 = vpop.f32.mrf.mxu0 }
 0x18b   :  { %v195_v56 = vpop.f32.mrf.mxu1 }
 0x18c   :  { %v196_v57 = vadd.f32 %v255_v55, %v195_v56 }
 0x18e   :  { %199 = vst.msk [vmem:[%s414_s9] sm:$0xff] %vm198_vm0, %v196_v57 }

// kernel: forward.1
= control target key start
LH: loop header
LB: loop body
LE: loop exit
PB: predicated region body
PF: predicated region fallthrough
CT: control target
= control target key end

     0   :  { %v256_v0 = vmov 0   ;;  %v257_v2 = vmov 2   ;;  %v258_v6 = vmov 1   ;;  %vm198_vm0 = vcmask 7168   ;;  %s405_s0 = inlined_call_operand.vmem [shape: f32[8,3], index: 0, kind: input, shape index: {}]   ;;  %s406_s5 = inlined_call_operand.vmem [shape: bf16[128,128], index: 5, kind: input, shape index: {}]   ;;  %s407_s3 = inlined_call_operand.vmem [shape: f32[1,128], index: 3, kind: input, shape index: {}]   ;;  %s408_s4 = inlined_call_operand.vmem [shape: f32[1,128], index: 4, kind: input, shape index: {}]   ;;  %s409_s1 = inlined_call_operand.vmem [shape: f32[8,1], index: 1, kind: input, shape index: {}]   ;;  %s410_s6 = inlined_call_operand.vmem [shape: f32[1,128], index: 6, kind: input, shape index: {}]   ;;  %s411_s7 = inlined_call_operand.vmem [shape: f32[128,1], index: 7, kind: input, shape index: {}]   ;;  %s412_s2 = inlined_call_operand.vmem [shape: f32[3,128], index: 2, kind: input, shape index: {}]   ;;  %s413_s8 = inlined_call_operand.<no memory space> [shape: f32[1,1], index: 8, kind: input, shape index: {}]   ;;  %s414_s9 = inlined_call_operand.vmem [shape: f32[8,1], index: 9, kind: output, shape index: {}]  }
   0x1   :  { %247 = vset.pattern.permute.xlu0 %v256_v0  ;;  %v34_v1 = vld [vmem:[%s405_s0] sm:$0xff]  ;;  %249 = vset.pattern.permute.xlu1 %v257_v2  ;;  %v243_v3 = vld [vmem:[%s406_s5 + $0x38] sm:$0xff]  ;;  %v242_v4 = vld [vmem:[%s406_s5 + $0x30] sm:$0xff]  ;;  %v14_v49 = vstv %s413_s8 }
   0x2   :  { %38 = vperm.xlu0 %247, %v34_v1   ;;  %51 = vperm.xlu1 %249, %v34_v1   ;;  %v57_v5 = vld [vmem:[%s409_s1] sm:$0xff]  ;;  %v241_v7 = vld [vmem:[%s406_s5 + $0x28] sm:$0xff]  ;;  %v239_v9 = vld [vmem:[%s406_s5 + $0x18] sm:$0xff]  ;;  %15 = vst [vmem:[#allocation2] sm:$0x1] %v14_v49 }
   0x3   :  { %144 = vmatpush.bf16.msra.mxu0 %v243_v3  ;;  %v240_v8 = vld [vmem:[%s406_s5 + $0x20] sm:$0xff]  ;;  %v238_v10 = vld [vmem:[%s406_s5 + $0x10] sm:$0xff]  ;;  %v237_v11 = vld [vmem:[%s406_s5 + $0x8] sm:$0xff] }
   0x4   :  { %v236_v12 = vld [vmem:[%s406_s5] sm:$0xff]  ;;  %v173_v13 = vld [vmem:[%s411_s7 + $0x78] sm:$0xff]  ;;  %v172_v14 = vld [vmem:[%s411_s7 + $0x70] sm:$0xff] }
   0x5   :  { %178 = vmatpush.msra.mxu1 %v173_v13  ;;  %v171_v15 = vld [vmem:[%s411_s7 + $0x68] sm:$0xff]  ;;  %v170_v16 = vld [vmem:[%s411_s7 + $0x60] sm:$0xff]  ;;  %v169_v17 = vld [vmem:[%s411_s7 + $0x58] sm:$0xff] }
   0x6   :  { %v168_v20 = vld [vmem:[%s411_s7 + $0x50] sm:$0xff]  ;;  %v167_v21 = vld [vmem:[%s411_s7 + $0x48] sm:$0xff]  ;;  %v35_v22 = vld [vmem:[%s412_s2] sm:$0x7] }
   0x7   :  { %145 = vmatpush.bf16.msra.mxu0 %v242_v4  ;;  %179 = vmatpush.msra.mxu1 %v172_v14  ;;  %v166_v23 = vld [vmem:[%s411_s7 + $0x40] sm:$0xff]  ;;  %v41_v24 = vperm.slane %v35_v22, 0  ;;  %v47_v25 = vperm.slane %v35_v22, 1  ;;  %v165_v26 = vld [vmem:[%s411_s7 + $0x38] sm:$0xff]  ;;  %v54_v27 = vperm.slane %v35_v22, 2  ;;  %v164_v29 = vld [vmem:[%s411_s7 + $0x30] sm:$0xff] }
   0x8   :  { %v252_v28 = vld [vmem:[%s407_s3] ss:$0 sm:$0xff]  ;;  %v163_v34 = vld [vmem:[%s411_s7 + $0x28] sm:$0xff]  ;;  %v161_v41 = vld [vmem:[%s411_s7 + $0x18] sm:$0xff] }
   0x9   :  { %180 = vmatpush.msra.mxu1 %v171_v15  ;;  %v162_v38 = vld [vmem:[%s411_s7 + $0x20] sm:$0xff]  ;;  %v160_v46 = vld [vmem:[%s411_s7 + $0x10] sm:$0xff]  ;;  %v159_v47 = vld [vmem:[%s411_s7 + $0x8] sm:$0xff] }
   0xa   :  { %248 = vset.pattern.permute.xlu0 %v258_v6  ;;  %250 = vset.pattern.permute.xlu1 %v256_v0  ;;  %v253_v40 = vld [vmem:[%s408_s4] ss:$0 sm:$0xff] }
   0xb   :  { %44 = vperm.xlu0 %248, %v34_v1   ;;  %61 = vperm.xlu1 %250, %v57_v5   ;;  %v158_v48 = vld [vmem:[%s411_s7] sm:$0xff] }
   0xc   :  { %146 = vmatpush.bf16.msra.mxu0 %v241_v7  ;;  %181 = vmatpush.msra.mxu1 %v170_v16  ;;  %v254_v50 = vld [vmem:[%s410_s6] ss:$0 sm:$0xff] }
   0xd   :  { %v255_v55 = vld [vmem:[#allocation2] ss:$0 sm:$0xff] }
   0xe   :  { %182 = vmatpush.msra.mxu1 %v169_v17 }
  0x10   :  { %147 = vmatpush.bf16.msra.mxu0 %v240_v8  ;;  %183 = vmatpush.msra.mxu1 %v168_v20 }
  0x12   :  { %184 = vmatpush.msra.mxu1 %v167_v21 }
  0x13   :  { %251 = vset.pattern.permute.xlu0 %v256_v0 }
  0x14   :  { %148 = vmatpush.bf16.msra.mxu0 %v239_v9  ;;  %185 = vmatpush.msra.mxu1 %v166_v23 }
  0x16   :  { %186 = vmatpush.msra.mxu1 %v165_v26 }
  0x18   :  { %149 = vmatpush.bf16.msra.mxu0 %v238_v10  ;;  %187 = vmatpush.msra.mxu1 %v164_v29 }
  0x1a   :  { %188 = vmatpush.msra.mxu1 %v163_v34 }
  0x1c   :  { %150 = vmatpush.bf16.msra.mxu0 %v237_v11  ;;  %189 = vmatpush.msra.mxu1 %v162_v38 }
  0x1e   :  { %190 = vmatpush.msra.mxu1 %v161_v41 }
  0x20   :  { %151 = vmatpush.bf16.msra.mxu0 %v236_v12  ;;  %191 = vmatpush.msra.mxu1 %v160_v46 }
  0x22   :  { %192 = vmatpush.msra.mxu1 %v159_v47 }
  0x24   :  { %193 = vmatpush.msra.mxu1 %v158_v48 }
  0x74   :  { %v39_v18 = vpop.permute.xlu0 %38  ;;  %v52_v19 = vpop.permute.xlu1 %51 }
  0x75   :  { %v42_v32 = vmul.f32 %v41_v24, %v39_v18  ;;  %v55_v35 = vmul.f32 %v54_v27, %v52_v19 }
  0x7d   :  { %v45_v30 = vpop.permute.xlu0 %44  ;;  %v62_v31 = vpop.permute.xlu1 %61 }
  0x7e   :  { %v48_v33 = vmul.f32 %v47_v25, %v45_v30  ;;  %v67_v37 = vmul.f32 %v252_v28, %v62_v31 }
  0x80   :  { %v49_v36 = vadd.f32 %v48_v33, %v42_v32 }
  0x82   :  { %v56_v39 = vadd.f32 %v55_v35, %v49_v36 }
  0x84   :  { %v68_v42 = vadd.f32 %v67_v37, %v56_v39 }
  0x86   :  { %v73_v43 = vadd.f32 %v253_v40, %v68_v42 }
  0x88   :  { %v74_v44 = vmax.f32 %v73_v43, 0.0 }
  0x8a   :  { %v75_v45 = vpack.c.bf16 %v74_v44, %v74_v44 }
  0x8c   :  { %152 = vmatmul.bf16.vlgmr.msra.gmra.mxu0 %v75_v45 }
 0x109   :  { %v153_v51 = vpop.f32.mrf.mxu0 }
 0x10a   :  { %v154_v52 = vadd.f32 %v254_v50, %v153_v51 }
 0x10c   :  { %v157_v53 = vmax.f32 %v154_v52, 0.0 }
 0x10e   :  { %194 = vmatmul.f32.vlgmr.msra.gmra.mxu1 %v157_v53 }
 0x111   :  { %v155_v54 = vpop.f32.mrf.mxu0 }
 0x18b   :  { %v195_v56 = vpop.f32.mrf.mxu1 }
 0x18c   :  { %v196_v57 = vadd.f32 %v255_v55, %v195_v56 }
 0x18e   :  { %199 = vst.msk [vmem:[%s414_s9] sm:$0xff] %vm198_vm0, %v196_v57 }

</bundles_post_ra>
